<compile_context>
chip_gen: v7x
topology: tpu7x:2x2x1
jax: 0.10.0
libtpu: 0.0.40
codegen_flags: <defaults>
</compile_context>

<pallas_src>
import jax
import jax.numpy as jnp
from jax.experimental import pallas as pl
from jax.experimental.pallas import tpu as pltpu


def outconv_kernel(w_ref, b_ref, x_ref, o_ref):
    # w_ref: (C_out, C_in) f32 in SMEM (scalar reads)
    # b_ref: (C_out,)      f32 in SMEM
    # x_ref: (1, C_in,  tM) f32 in VMEM  -- channel-major, lane-dense along M
    # o_ref: (1, C_out, tM) f32 in VMEM  -- lane-dense along M
    x = x_ref[0]                                   # (C_in, tM)
    c_in = x.shape[0]
    c_out = o_ref.shape[1]

    # Hoist per-input-channel row views once (reused across all output chans).
    xs = [x[ci:ci + 1, :] for ci in range(c_in)]   # each (1, tM)

    rows = []
    for co in range(c_out):
        acc = xs[0] * w_ref[co, 0]
        for ci in range(1, c_in):
            acc = acc + xs[ci] * w_ref[co, ci]
        rows.append(acc + b_ref[co])

    # Single lane-dense store of the whole (C_out, tM) result tile.
    o_ref[0] = jnp.concatenate(rows, axis=0).astype(o_ref.dtype)


def outconv_1x1(x_nchw, weight, bias, *, m_tile=64 * 1024):
    """1x1 Conv2d forward (NCHW in / NCHW out) with no layout transposes.

    x_nchw: (N, C_in, H, W)
    weight: (C_out, C_in) or (C_out, C_in, 1, 1) (PyTorch layout)
    bias:   (C_out,)
    """
    if weight.ndim == 4:
        weight = weight[:, :, 0, 0]
    N, C_in, H, W = x_nchw.shape
    C_out = weight.shape[0]
    M = H * W

    # Channel-major flatten: metadata-only reshape, already (C_in, M) per image.
    x_cm = x_nchw.reshape(N, C_in, M)

    # Lane-dense M tile: whole image plane if it fits, else a large multiple
    # of 128 (partial trailing tiles are handled by Pallas).
    tM = M if M <= m_tile else m_tile
    grid_m = pl.cdiv(M, tM)

    cost = pl.CostEstimate(
        flops=2 * N * M * C_in * C_out,
        transcendentals=0,
        bytes_accessed=4 * N * M * (C_in + C_out) + 4 * C_out * (C_in + 1),
    )

    out_cm = pl.pallas_call(
        outconv_kernel,
        out_shape=jax.ShapeDtypeStruct((N, C_out, M), x_cm.dtype),
        grid_spec=pl.GridSpec(
            grid=(N, grid_m),
            in_specs=[
                # Tiny weight/bias live in SMEM, resident for the whole kernel.
                pl.BlockSpec(memory_space=pltpu.MemorySpace.SMEM),
                pl.BlockSpec(memory_space=pltpu.MemorySpace.SMEM),
                # Activations: channel-major, M on the lane axis.
                pl.BlockSpec((1, C_in, tM), lambda n, m: (n, 0, m)),
            ],
            out_specs=pl.BlockSpec((1, C_out, tM), lambda n, m: (n, 0, m)),
        ),
        compiler_params=pltpu.CompilerParams(
            dimension_semantics=("parallel", "parallel"),
            vmem_limit_bytes=32 * 1024 * 1024,  # safe on v5e/v6e/v7x; buffers << limit
        ),
        cost_estimate=cost,
    )(weight, bias, x_cm)

    # Free reshape back to NCHW (no transpose needed).
    return out_cm.reshape(N, C_out, H, W)


if __name__ == "__main__":
    # Shapes consistent with OutConv(in_channels=4, out_channels=3)
    N, C_in, H, W = 2, 4, 16, 16
    C_out = 3

    key = jax.random.PRNGKey(0)
    kx, kw, kb = jax.random.split(key, 3)

    x = jax.random.normal(kx, (N, C_in, H, W), dtype=jnp.float32)
    # PyTorch Conv2d params: weight (C_out, C_in, 1, 1), bias (C_out,)
    fan_in = float(C_in)  # kernel_size = 1 -> fan_in = C_in
    bound = 1.0 / (fan_in ** 0.5)
    weight4d = jax.random.uniform(kw, (C_out, C_in, 1, 1), jnp.float32, -bound, bound)
    bias = jax.random.uniform(kb, (C_out,), jnp.float32, -bound, bound)

    out = outconv_1x1(x, weight4d, bias)
    out = jax.block_until_ready(out)

    # Reference check against plain-JAX 1x1 conv (einsum over channels)
    weight = weight4d[:, :, 0, 0]
    ref = jnp.einsum("nchw,oc->nohw", x, weight) + bias[None, :, None, None]
    assert out.shape == (N, C_out, H, W)
    assert jnp.allclose(out, ref, atol=1e-5, rtol=1e-5)

    print("KERNEL_OK")
</pallas_src>

<mosaic_0001>
module attributes {stable_mosaic.version = 11 : i64} {
  func.func @outconv_kernel(%arg0: i32, %arg1: i32, %arg2: memref<3x4xf32, #tpu.memory_space<smem>>, %arg3: memref<3xf32, #tpu.memory_space<smem>>, %arg4: memref<1x4x256xf32, #tpu.memory_space<vmem>>, %arg5: memref<1x3x256xf32, #tpu.memory_space<vmem>>) attributes {dimension_semantics = [#tpu.dimension_semantics<parallel>, #tpu.dimension_semantics<parallel>], iteration_bounds = array<i64: 2, 1>, scalar_prefetch = 0 : i64, scratch_operands = 0 : i64, tpu.core_type = #tpu.core_type<tc>, window_params = [{transform_indices = @transform_0, window_bounds = array<i64: 3, 4>}, {transform_indices = @transform_1, window_bounds = array<i64: 3>}, {transform_indices = @transform_2, window_bounds = array<i64: 1, 4, 256>}, {transform_indices = @transform_3, window_bounds = array<i64: 1, 3, 256>}]} {
    %c0 = arith.constant 0 : index
    %c0_0 = arith.constant 0 : index
    %c0_1 = arith.constant 0 : index
    %0 = vector.load %arg4[%c0, %c0_0, %c0_1] : memref<1x4x256xf32, #tpu.memory_space<vmem>>, vector<1x4x256xf32>
    %1 = vector.shape_cast %0 : vector<1x4x256xf32> to vector<4x256xf32>
    %2 = vector.extract_strided_slice %1 {offsets = [0, 0], sizes = [1, 256], strides = [1, 1]} : vector<4x256xf32> to vector<1x256xf32>
    %3 = vector.extract_strided_slice %1 {offsets = [1, 0], sizes = [1, 256], strides = [1, 1]} : vector<4x256xf32> to vector<1x256xf32>
    %4 = vector.extract_strided_slice %1 {offsets = [2, 0], sizes = [1, 256], strides = [1, 1]} : vector<4x256xf32> to vector<1x256xf32>
    %5 = vector.extract_strided_slice %1 {offsets = [3, 0], sizes = [1, 256], strides = [1, 1]} : vector<4x256xf32> to vector<1x256xf32>
    %c0_2 = arith.constant 0 : index
    %c0_3 = arith.constant 0 : index
    %6 = memref.load %arg2[%c0_2, %c0_3] : memref<3x4xf32, #tpu.memory_space<smem>>
    %7 = vector.broadcast %6 : f32 to vector<1x256xf32>
    %8 = arith.mulf %2, %7 : vector<1x256xf32>
    %c0_4 = arith.constant 0 : index
    %c1 = arith.constant 1 : index
    %9 = memref.load %arg2[%c0_4, %c1] : memref<3x4xf32, #tpu.memory_space<smem>>
    %10 = vector.broadcast %9 : f32 to vector<1x256xf32>
    %11 = arith.mulf %3, %10 : vector<1x256xf32>
    %12 = arith.addf %8, %11 : vector<1x256xf32>
    %c0_5 = arith.constant 0 : index
    %c2 = arith.constant 2 : index
    %13 = memref.load %arg2[%c0_5, %c2] : memref<3x4xf32, #tpu.memory_space<smem>>
    %14 = vector.broadcast %13 : f32 to vector<1x256xf32>
    %15 = arith.mulf %4, %14 : vector<1x256xf32>
    %16 = arith.addf %12, %15 : vector<1x256xf32>
    %c0_6 = arith.constant 0 : index
    %c3 = arith.constant 3 : index
    %17 = memref.load %arg2[%c0_6, %c3] : memref<3x4xf32, #tpu.memory_space<smem>>
    %18 = vector.broadcast %17 : f32 to vector<1x256xf32>
    %19 = arith.mulf %5, %18 : vector<1x256xf32>
    %20 = arith.addf %16, %19 : vector<1x256xf32>
    %c0_7 = arith.constant 0 : index
    %21 = memref.load %arg3[%c0_7] : memref<3xf32, #tpu.memory_space<smem>>
    %22 = vector.broadcast %21 : f32 to vector<1x256xf32>
    %23 = arith.addf %20, %22 : vector<1x256xf32>
    %c1_8 = arith.constant 1 : index
    %c0_9 = arith.constant 0 : index
    %24 = memref.load %arg2[%c1_8, %c0_9] : memref<3x4xf32, #tpu.memory_space<smem>>
    %25 = vector.broadcast %24 : f32 to vector<1x256xf32>
    %26 = arith.mulf %2, %25 : vector<1x256xf32>
    %c1_10 = arith.constant 1 : index
    %c1_11 = arith.constant 1 : index
    %27 = memref.load %arg2[%c1_10, %c1_11] : memref<3x4xf32, #tpu.memory_space<smem>>
    %28 = vector.broadcast %27 : f32 to vector<1x256xf32>
    %29 = arith.mulf %3, %28 : vector<1x256xf32>
    %30 = arith.addf %26, %29 : vector<1x256xf32>
    %c1_12 = arith.constant 1 : index
    %c2_13 = arith.constant 2 : index
    %31 = memref.load %arg2[%c1_12, %c2_13] : memref<3x4xf32, #tpu.memory_space<smem>>
    %32 = vector.broadcast %31 : f32 to vector<1x256xf32>
    %33 = arith.mulf %4, %32 : vector<1x256xf32>
    %34 = arith.addf %30, %33 : vector<1x256xf32>
    %c1_14 = arith.constant 1 : index
    %c3_15 = arith.constant 3 : index
    %35 = memref.load %arg2[%c1_14, %c3_15] : memref<3x4xf32, #tpu.memory_space<smem>>
    %36 = vector.broadcast %35 : f32 to vector<1x256xf32>
    %37 = arith.mulf %5, %36 : vector<1x256xf32>
    %38 = arith.addf %34, %37 : vector<1x256xf32>
    %c1_16 = arith.constant 1 : index
    %39 = memref.load %arg3[%c1_16] : memref<3xf32, #tpu.memory_space<smem>>
    %40 = vector.broadcast %39 : f32 to vector<1x256xf32>
    %41 = arith.addf %38, %40 : vector<1x256xf32>
    %c2_17 = arith.constant 2 : index
    %c0_18 = arith.constant 0 : index
    %42 = memref.load %arg2[%c2_17, %c0_18] : memref<3x4xf32, #tpu.memory_space<smem>>
    %43 = vector.broadcast %42 : f32 to vector<1x256xf32>
    %44 = arith.mulf %2, %43 : vector<1x256xf32>
    %c2_19 = arith.constant 2 : index
    %c1_20 = arith.constant 1 : index
    %45 = memref.load %arg2[%c2_19, %c1_20] : memref<3x4xf32, #tpu.memory_space<smem>>
    %46 = vector.broadcast %45 : f32 to vector<1x256xf32>
    %47 = arith.mulf %3, %46 : vector<1x256xf32>
    %48 = arith.addf %44, %47 : vector<1x256xf32>
    %c2_21 = arith.constant 2 : index
    %c2_22 = arith.constant 2 : index
    %49 = memref.load %arg2[%c2_21, %c2_22] : memref<3x4xf32, #tpu.memory_space<smem>>
    %50 = vector.broadcast %49 : f32 to vector<1x256xf32>
    %51 = arith.mulf %4, %50 : vector<1x256xf32>
    %52 = arith.addf %48, %51 : vector<1x256xf32>
    %c2_23 = arith.constant 2 : index
    %c3_24 = arith.constant 3 : index
    %53 = memref.load %arg2[%c2_23, %c3_24] : memref<3x4xf32, #tpu.memory_space<smem>>
    %54 = vector.broadcast %53 : f32 to vector<1x256xf32>
    %55 = arith.mulf %5, %54 : vector<1x256xf32>
    %56 = arith.addf %52, %55 : vector<1x256xf32>
    %c2_25 = arith.constant 2 : index
    %57 = memref.load %arg3[%c2_25] : memref<3xf32, #tpu.memory_space<smem>>
    %58 = vector.broadcast %57 : f32 to vector<1x256xf32>
    %59 = arith.addf %56, %58 : vector<1x256xf32>
    %60 = tpu.concatenate %23, %41, %59 in 0 : vector<1x256xf32>, vector<1x256xf32>, vector<1x256xf32> -> vector<3x256xf32>
    %c0_26 = arith.constant 0 : index
    %c0_27 = arith.constant 0 : index
    %c0_28 = arith.constant 0 : index
    %61 = vector.load %arg5[%c0_26, %c0_27, %c0_28] : memref<1x3x256xf32, #tpu.memory_space<vmem>>, vector<1x3x256xf32>
    %62 = vector.shape_cast %61 : vector<1x3x256xf32> to vector<3x256xf32>
    %63 = vector.shape_cast %60 : vector<3x256xf32> to vector<1x3x256xf32>
    tpu.vector_store %arg5[%c0_26, %c0_27, %c0_28], %63 {strides = array<i32>} : memref<1x3x256xf32, #tpu.memory_space<vmem>>, vector<1x3x256xf32>,
    return
  }
  func.func @transform_0(%arg0: i32, %arg1: i32) -> (i32, i32) {
    %c0_i32 = arith.constant 0 : i32
    %c0_i32_0 = arith.constant 0 : i32
    %c0_i32_1 = arith.constant 0 : i32
    return %c0_i32, %c0_i32_0 : i32, i32
  }
  func.func @transform_1(%arg0: i32, %arg1: i32) -> i32 {
    %c0_i32 = arith.constant 0 : i32
    %c0_i32_0 = arith.constant 0 : i32
    return %c0_i32 : i32
  }
  func.func @transform_2(%arg0: i32, %arg1: i32) -> (i32, i32, i32) {
    %c0_i32 = arith.constant 0 : i32
    %c0_i32_0 = arith.constant 0 : i32
    return %arg0, %c0_i32, %arg1 : i32, i32, i32
  }
  func.func @transform_3(%arg0: i32, %arg1: i32) -> (i32, i32, i32) {
    %c0_i32 = arith.constant 0 : i32
    %c0_i32_0 = arith.constant 0 : i32
    return %arg0, %c0_i32, %arg1 : i32, i32, i32
  }
}

</mosaic_0001>

<bundles_post_ra>
// kernel: tpu_custom_call.1
= control target key start
LH: loop header
LB: loop body
LE: loop exit
PB: predicated region body
PF: predicated region fallthrough
CT: control target
= control target key end

     0   :  { %8 = vsyncpa [#allocation4], 0  ;;  %s939_s0 = inlined_call_operand.hbm [shape: f32[3,4], index: 0, kind: input, shape index: {}]   ;;  %s940_s1 = inlined_call_operand.vmem [shape: f32[3], index: 1, kind: input, shape index: {}]   ;;  %s941_s2 = inlined_call_operand.hbm [shape: f32[2,4,256], index: 2, kind: input, shape index: {}]   ;;  %s942_s3 = inlined_call_operand.vmem [shape: f32[2,3,256], index: 3, kind: output, shape index: {}]  }
   0x1   :  { %9 = vsyncpa [#allocation5], 0 }
   0x2   :  { %10 = vsyncpa [#allocation3], 0 }
   0x3   :  { %12 = vsyncpa [#allocation3 + $0x1], 0  ;;  %s754_s12 = smov 0   ;;  %s756_s13 = smov 0  }
   0x4   :  { %s758_s14 = smov 0   ;;  %s760_s15 = smov 0  }
   0x5   :  { %s762_s16 = smov 0   ;;  %s764_s17 = smov 0  }
   0x6 LB: > { %s496_s18 = sadd.s32 4294967295, %s729_s17   ;;  %p94_p0 = scmp.ne.s32.totalorder %s713_s13, %s709_s12  ;;  %s729_s17 = sphi %s764_s17, %s18_s17   ;;  %s725_s16 = sphi %s762_s16, %s958_s16   ;;  %s721_s15 = sphi %s760_s15, %s957_s15   ;;  %s717_s14 = sphi %s758_s14, %s956_s14   ;;  %s713_s13 = sphi %s756_s13, %s955_s13   ;;  %s709_s12 = sphi %s754_s12, %s954_s12  }
   0x7   : > { %p784_p1 = scmp.eq.s32.totalorder %s496_s18, 0  ;;  %p498_p2 = scmp.ge.s32.totalorder %s729_s17, 1 }
   0x8   : > { %p133_p3 = scmp.lt.s32.totalorder %s729_s17, 3  ;;  %s155_s24 = sshll.u32 %s940_s1, 4  ;;  %s156_s24 = int_to_ptr.vmem [resolvable:$true] %s155_s24 }
   0x9   : > { %s946_s19 = scalar_select %p784_p1, 1, 0 }
   0xa   : > { %p792_p4 = por %p784_p1, %p94_p0  ;;  %p796_p5 = pnand %p498_p2, %p133_p3 }
   0xb   : > { %s30_s26 = sadd.s32 1, %s725_s16  ;;  %s613_s30 = scalar_lea.hbm %s939_s0, 64 }
   0xc   : > { %s947_s20 = scalar_select %p792_p4, 1, 0 }
   0xd   : > { %p547_p6 = pneg %p796_p5  ;;  %p812_p8 = scmp.ge.s32.totalorder %s30_s26, 2 }
   0xe   : > { %p614_p9 = scmp.ne.s32.totalorder %s939_s0, %s613_s30  ;;  %p620_p13 = scmp.lt.u32.totalorder %s613_s30, %s939_s0 }
   0xf   : > { %p807_p7 = pnand %p547_p6, %p784_p1 }
  0x11   : > { %p615_p10 = pneg %p807_p7 }
  0x13   : > { %p616_p11 = pnand %p615_p10, %p614_p9 }
  0x15   : > { %p617_p12 = pneg %p616_p11 }
  0x17   : > { %p622_p0 = pnand %p620_p13, %p617_p12 }
  0x19   : > { %625 = shalt.err (!%p622_p0)
}
  0x1a   : > { %s731_s8 = smov [#allocation2]   ;;  %s626_s11 = scalar_lea.vmem %s156_s24, 16 }
  0x1b   : > { %550 = dma.hbm_to_smem (!%p807_p7), %s939_s0, 64, %s731_s8, [#allocation4]  }
  0x1c   : > { %p627_p2 = scmp.ne.s32.totalorder %s156_s24, %s626_s11  ;;  %p634_p4 = scmp.lt.s32.totalorder %s156_s24, %s156_s24 }
  0x1d   : > { %p635_p9 = scmp.lt.s32.totalorder %s626_s11, %s626_s11 }
  0x1e   : > { %p629_p3 = pnand %p627_p2, %p615_p10 }
  0x1f   : > { %p636_p11 = por %p635_p9, %p634_p4 }
  0x20   : > { %p630_p6 = pneg %p629_p3 }
  0x22   : > { %p637_p1 = pnand %p636_p11, %p630_p6 }
  0x24   : > { %640 = shalt.err (!%p637_p1)
}
  0x25   : > { %s732_s12 = smov [#allocation6]   ;;  %s960_s26 = smov (%p812_p8, %s30_s26), 0 }
  0x26   : > { %553 = dma.vmem_to_smem (!%p807_p7), %s156_s24, 16, %s732_s12, [#allocation5]  }
  0x27   : > { %s81_s18 = sadd.s32 1, %s717_s14  ;;  %p88_p1 = scmp.ne.s32.totalorder %s717_s14, %s713_s13 }
  0x28   : > { %s76_s22 = ssub.s32 %s725_s16, %s960_s26  ;;  %p89_p4 = scmp.eq.s32.totalorder %s729_s17, 0 }
  0x29   : > { %p79_p10 = scmp.eq.s32.totalorder %s76_s22, 0  ;;  %p560_p12 = scmp.lt.s32.totalorder %s729_s17, 2 }
  0x2a   : > { %p90_p13 = por %p89_p4, %p88_p1  ;;  %s166_s23 = sand.u32 1, %s717_s14  }
  0x2b   : > { %s847_s25 = scalar_select %p79_p10, %s717_s14, %s81_s18  }
  0x2c   : > { %s502_s28 = sshll.u32 %s166_s23, 3  ;;  %s535_s29 = sshll.u32 %s725_s16, 7 }
  0x2d   : > { %s853_s24 = scalar_lea.hbm %s941_s2, %s535_s29  ;;  %s170_s27 = scalar_lea.vmem [#allocation7], %s502_s28 }
  0x2e   : > { %s180_s5 = sshll.u32 %s170_s27, 4  ;;  %p857_p7 = pnand %p560_p12, %p90_p13  ;;  %s855_s5 = int_to_ptr.vmem [resolvable:$true] %s180_s5 }
  0x2f   : > { %s167_s7 = scalar_lea.sflag [#allocation3], %s166_s23  ;;  %s641_s8 = scalar_lea.hbm %s853_s24, 128 }
  0x30   : > { %p642_p8 = scmp.ne.s32.totalorder %s853_s24, %s641_s8  ;;  %p643_p0 = pneg %p857_p7 }
  0x31   : > { %s646_s11 = scalar_lea.hbm %s941_s2, 256  ;;  %p647_p6 = scmp.lt.u32.totalorder %s853_s24, %s941_s2 }
  0x32   : > { %p644_p2 = pnand %p643_p0, %p642_p8  ;;  %p648_p9 = scmp.lt.u32.totalorder %s646_s11, %s641_s8 }
  0x33   : > { %p650_p1 = scmp.lt.u32.totalorder %s641_s8, %s853_s24 }
  0x34   : > { %p645_p3 = pneg %p644_p2  ;;  %p649_p11 = por %p648_p9, %p647_p6 }
  0x36   : > { %p651_p4 = por %p650_p1, %p649_p11 }
  0x38   : > { %p652_p10 = pnand %p651_p4, %p645_p3 }
  0x3a   : > { %655 = shalt.err (!%p652_p10)
}
  0x3b   : > { %s656_s22 = scalar_lea.vmem %s855_s5, 128  ;;  %s733_s23 = smov [#allocation7]  }
  0x3c   : > { %p657_p12 = scmp.ne.s32.totalorder %s855_s5, %s656_s22  ;;  %s661_s28 = sshll.u32 %s733_s23, 4  ;;  %s662_s28 = int_to_ptr.vmem [resolvable:$false] %s661_s28 }
  0x3d   : > { %s663_s29 = scalar_lea.vmem %s662_s28, 256  ;;  %p664_p2 = scmp.lt.s32.totalorder %s855_s5, %s662_s28 }
  0x3e   : > { %p659_p13 = pnand %p657_p12, %p643_p0  ;;  %p665_p6 = scmp.lt.s32.totalorder %s663_s29, %s656_s22 }
  0x40   : > { %p660_p8 = pneg %p659_p13  ;;  %p666_p9 = por %p665_p6, %p664_p2 }
  0x42   : > { %p667_p11 = pnand %p666_p9, %p660_p8 }
  0x44   : > { %670 = shalt.err (!%p667_p11)
}
  0x45   : > { %557 = dma.hbm_to_vmem [thread:$0]  (!%p857_p7), %s853_s24, 128, %s855_s5, %s167_s7  }
  0x46   : > { %189 = sbr.rel (%p796_p5) target bundleno = 118 (0x76), region = 32  ;;  %p952_p0 = scmp.ne.s32.totalorder (!%p796_p5), %s946_s19, 0 }
  0x4d   : > { %696 = dma.done.wait (%p952_p0), [#allocation4], 64  }
  0x4e   : > { %698 = vsyncadd (%p952_p0), [#allocation4], 4294967232 }
  0x4f   : > { %700 = dma.done.wait (%p952_p0), [#allocation5], 16  }
  0x50   : > { %702 = vsyncadd (%p952_p0), [#allocation5], 4294967280  ;;  %s199_s30 = sand.u32 1, %s713_s13   ;;  %p953_p7 = scmp.ne.s32.totalorder %s947_s20, 0 }
  0x51   : > { %s508_s4 = sshll.u32 %s199_s30, 3  ;;  %s200_s24 = scalar_lea.sflag [#allocation3], %s199_s30 }
  0x52   : > { %s203_s27 = scalar_lea.vmem [#allocation7], %s508_s4 }
  0x53   : > { %704 = dma.done.wait (%p953_p7), %s200_s24, 128  }
  0x54   : > { %706 = vsyncadd (%p953_p7), %s200_s24, 4294967168 }
  0x55   : > { %208 = sfence }
  0x56   : > { %s243_s21 = sld [smem:[#allocation2]]  ;;  %s511_s5 = sld [smem:[#allocation2 + $0x1]]  ;;  %v242_v0 = vld [vmem:[%s203_s27] sm:$0xff]  ;;  %v334_v4 = vlaneseq  ;;  %vm366_vm0 = vcmask 1040384   ;;  %vm369_vm1 = vcmask 1041408  }
  0x57   : > { %s513_s6 = sld [smem:[#allocation2 + $0x2]]  ;;  %s515_s7 = sld [smem:[#allocation2 + $0x3]] }
  0x58   : > { %s517_s8 = sld [smem:[#allocation2 + $0x80]]  ;;  %s518_s9 = sld [smem:[#allocation2 + $0x81]]  ;;  %v335_v15 = vshrl.u32 %v334_v4, 7 }
  0x59   : > { %s901_s19 = sld [smem:[#allocation6]]  ;;  %s520_s10 = sld [smem:[#allocation2 + $0x82]] }
  0x5a   : > { %s522_s11 = sld [smem:[#allocation2 + $0x83]]  ;;  %s525_s12 = sld [smem:[#allocation2 + $0x100]]  ;;  %v336_v40 = vsub.s32 0, %v335_v15  ;;  %v340_v44 = vsub.s32 4, %v335_v15 }
  0x5b   : > { %s903_s20 = sld [smem:[#allocation2 + $0x101]]  ;;  %s905_s18 = sld [smem:[#allocation2 + $0x102]] }
  0x5c   : > { %v244_v1 = vstv %s243_s21  ;;  %v247_v2 = vstv %s511_s5  ;;  %s907_s22 = sld [smem:[#allocation2 + $0x103]]  ;;  %s909_s23 = sld [smem:[#allocation6 + $0x1]] }
  0x5d   : > { %v255_v3 = vstv %s513_s6  ;;  %v245_v5 = vmul.f32 %v244_v1, %v242_v0  ;;  %v248_v6 = vmul.f32 %v247_v2, %v242_v0  ;;  %v263_v8 = vstv %s515_s7  ;;  %s532_s28 = sld [smem:[#allocation6 + $0x2]]  ;;  %p233_p5 = scmp.lt.s32.totalorder %s721_s15, 1 }
  0x5e   : > { %v256_v7 = vmul.f32 %v255_v3, %v242_v0  ;;  %v264_v11 = vmul.f32 %v263_v8, %v242_v0  ;;  %v274_v12 = vstv %s517_s8  ;;  %v277_v14 = vstv %s518_s9 }
  0x5f   : > { %v512_v9 = vrot.slane %v248_v6, 9  ;;  %v275_v13 = vmul.f32 %v274_v12, %v242_v0  ;;  %v278_v18 = vmul.f32 %v277_v14, %v242_v0  ;;  %v285_v19 = vstv %s520_s10  ;;  %s962_s15 = smov (!%p233_p5, %s721_s15), 1 }
  0x60   : > { %v514_v10 = vrot.slane %v256_v7, 10  ;;  %v516_v17 = vrot.slane %v264_v11, 11  ;;  %v271_v20 = vstv %s901_s19  ;;  %v286_v21 = vmul.f32 %v285_v19, %v242_v0  ;;  %s536_s29 = sshll.u32 %s962_s15, 3 }
  0x61   : > { %v253_v16 = vadd.f32 %v512_v9, %v245_v5  ;;  %v293_v22 = vstv %s522_s11  ;;  %v304_v23 = vstv %s525_s12  ;;  %v519_v25 = vrot.slane %v278_v18, 9  ;;  %s240_s24 = scalar_lea.vmem %s942_s3, %s536_s29 }
  0x62   : > { %v294_v26 = vmul.f32 %v293_v22, %v242_v0  ;;  %v305_v27 = vmul.f32 %v304_v23, %v242_v0  ;;  %v521_v28 = vrot.slane %v286_v21, 10  ;;  %v307_v29 = vstv %s903_s20 }
  0x63   : > { %v261_v24 = vadd.f32 %v514_v10, %v253_v16  ;;  %v315_v30 = vstv %s905_s18  ;;  %v323_v31 = vstv %s907_s22  ;;  %v283_v33 = vadd.f32 %v519_v25, %v275_v13 }
  0x64   : > { %v523_v34 = vrot.slane %v294_v26, 11  ;;  %v308_v35 = vmul.f32 %v307_v29, %v242_v0  ;;  %v316_v36 = vmul.f32 %v315_v30, %v242_v0  ;;  %v324_v37 = vmul.f32 %v323_v31, %v242_v0 }
  0x65   : > { %v269_v32 = vadd.f32 %v516_v17, %v261_v24  ;;  %v291_v38 = vadd.f32 %v521_v28, %v283_v33  ;;  %v301_v42 = vstv %s909_s23  ;;  %v331_v50 = vstv %s532_s28 }
  0x66   : > { %v527_v39 = vrot.slane %v308_v35, 9  ;;  %v529_v43 = vrot.slane %v316_v36, 10  ;;  %v531_v47 = vrot.slane %v324_v37, 11 }
  0x67   : > { %v272_v41 = vadd.f32 %v271_v20, %v269_v32  ;;  %v299_v45 = vadd.f32 %v523_v34, %v291_v38 }
  0x68   : > { %v313_v46 = vadd.f32 %v527_v39, %v305_v27 }
  0x69   : > { %v302_v48 = vadd.f32 %v301_v42, %v299_v45  ;;  %v337_v51 = vrot.slane %v272_v41, %v336_v40  ;;  %v341_v52 = vrot.slane %v272_v41, %v340_v44 }
  0x6a   : > { %v321_v49 = vadd.f32 %v529_v43, %v313_v46 }
  0x6b   : > { %v348_v54 = vrot.slane %v302_v48, %v336_v40  ;;  %v352_v55 = vrot.slane %v302_v48, %v340_v44 }
  0x6c   : > { %v329_v53 = vadd.f32 %v531_v47, %v321_v49 }
  0x6d   : > { %v367_v57 = vsel %vm366_vm0, %v337_v51, %v348_v54  ;;  %v368_v58 = vsel %vm366_vm0, %v341_v52, %v352_v55 }
  0x6e   : > { %v332_v56 = vadd.f32 %v331_v50, %v329_v53 }
  0x70   : > { %v359_v59 = vrot.slane %v332_v56, %v336_v40  ;;  %v363_v60 = vrot.slane %v332_v56, %v340_v44 }
  0x72   : > { %v370_v61 = vsel %vm369_vm1, %v367_v57, %v359_v59  ;;  %v371_v62 = vsel %vm369_vm1, %v368_v58, %v363_v60 }
  0x73   : > { %v374_v63 = vcombine.low %v370_v61, %v371_v62 }
  0x75   : > { %376 = vst [vmem:[%s240_s24] sm:$0x77] %v374_v63 }
  0x76 PF: > { %s18_s17 = sadd.s32 1, %s729_s17   ;;  %s954_s12 = smov %s713_s13 }
  0x77   : > { %p15_p3 = scmp.ge.s32.totalorder %s18_s17, 4   ;;  %s955_s13 = smov %s717_s14 }
  0x78   : > { %s956_s14 = smov %s847_s25  ;;  %s957_s15 = smov %s725_s16 }
  0x79   : > { %s958_s16 = smov %s960_s26  ;;  %17 = sbr.rel (!%p15_p3) target bundleno = 6 (0x6), region = 82 }
  0x80   :  { %407 = vsyncpa [#allocation3], 1 }
  0x81   :  { %409 = vsyncpa [#allocation3 + $0x1], 1 }
  0x82   :  { %410 = vsyncpa [#allocation4], 1 }
  0x83   :  { %412 = vsyncpa [#allocation4 + $0x1], 1 }
  0x84   :  { %413 = vsyncpa [#allocation5], 1 }
  0x85   :  { %415 = vsyncpa [#allocation5 + $0x1], 1 }

</bundles_post_ra>
